<compile_context>
chip_gen: v7x
topology: tpu7x:2x2x1
jax: 0.10.0
libtpu: 0.0.40
codegen_flags: <defaults>
</compile_context>

<pallas_src>
import jax
import jax.numpy as jnp
from jax.experimental import pallas as pl
from jax.experimental.pallas import tpu as pltpu


def _mish_kernel(x_ref, o_ref):
    x = x_ref[...].astype(jnp.float32)
    # mish(x) = x * tanh(softplus(x))
    # Exact identity: tanh(log1p(e^x)) = (t^2 + 2t) / (t^2 + 2t + 2), t = e^x.
    # For x > 20, tanh(softplus(x)) == 1 to f32 precision, so mish(x) == x
    # (matches PyTorch's softplus threshold=20 behaviour).
    t = jnp.exp(jnp.minimum(x, 20.0))
    q = t * t + 2.0 * t
    y = jnp.where(x > 20.0, x, x * (q / (q + 2.0)))
    o_ref[...] = y.astype(o_ref.dtype)


def _round_up(a, b):
    return ((a + b - 1) // b) * b


def mish(x, *, target_block_bytes=2 * 1024 * 1024):
    """Elementwise Mish over an arbitrarily-shaped array (NCHW expected)."""
    orig_shape = x.shape
    orig_dtype = x.dtype
    n = x.size
    if n == 0:
        return x

    # Widest lane-dense column width that divides the flat length -> reshape
    # is free, no pad/slice extra HBM pass.
    cols = None
    for c in (1024, 512, 256, 128):
        if n % c == 0:
            cols = c
            break

    pad = 0
    if cols is None:
        # Fallback for awkward sizes: minimal pad to one lane multiple.
        cols = 128
        pad = _round_up(n, cols) - n

    x_flat = jnp.ravel(x)
    if pad:
        x_flat = jnp.pad(x_flat, (0, pad))
    rows = (n + pad) // cols
    x2d = x_flat.reshape(rows, cols)

    # Block sizing: ~target_block_bytes per input block.  Row-tile multiple of
    # 16 keeps the block legal for both f32 (8,128) and bf16 (16,128) tiling.
    sub = 16
    itemsize = jnp.dtype(orig_dtype).itemsize
    desired_rows = max(sub, (target_block_bytes // (cols * itemsize)) // sub * sub)

    if rows > desired_rows:
        tile_rows = desired_rows
    elif rows > 4 * sub:
        # Big enough to split: keep >= 2 grid blocks so both v7x TensorCores
        # get work on the parallel grid axis.
        tile_rows = _round_up(pl.cdiv(rows, 2), sub)
    else:
        tile_rows = rows  # full-extent block (legal for any row count)

    grid = (pl.cdiv(rows, tile_rows),)  # partial last block is masked by Pallas

    out2d = pl.pallas_call(
        _mish_kernel,
        out_shape=jax.ShapeDtypeStruct((rows, cols), orig_dtype),
        grid_spec=pltpu.PrefetchScalarGridSpec(
            num_scalar_prefetch=0,
            grid=grid,
            in_specs=[pl.BlockSpec((tile_rows, cols), lambda i: (i, 0))],
            out_specs=pl.BlockSpec((tile_rows, cols), lambda i: (i, 0)),
        ),
        compiler_params=pltpu.CompilerParams(
            dimension_semantics=("parallel",),
        ),
    )(x2d)

    if pad:
        return out2d.reshape(-1)[:n].reshape(orig_shape)
    return out2d.reshape(orig_shape)


def _mish_ref(x):
    # Pure-JAX reference matching PyTorch: x * tanh(softplus(x)), threshold=20.
    xf = x.astype(jnp.float32)
    sp = jnp.where(xf > 20.0, xf, jnp.log1p(jnp.exp(jnp.minimum(xf, 20.0))))
    return (xf * jnp.tanh(sp)).astype(x.dtype)


if __name__ == "__main__":
    key = jax.random.PRNGKey(0)

    # Primary small NCHW input consistent with conv-style usage of Mish.
    x = jax.random.normal(key, (2, 4, 16, 16), dtype=jnp.float32) * 3.0
    y = jax.block_until_ready(mish(x))
    y_ref = _mish_ref(x)
    assert y.shape == x.shape and y.dtype == x.dtype
    assert jnp.allclose(y, y_ref, atol=1e-5, rtol=1e-5)

    # Multi-block path (rows split across the parallel grid axis).
    k1, k2 = jax.random.split(key)
    xb = jax.random.normal(k1, (2, 8, 64, 64), dtype=jnp.float32) * 4.0
    yb = jax.block_until_ready(mish(xb))
    assert jnp.allclose(yb, _mish_ref(xb), atol=1e-5, rtol=1e-5)

    # Awkward size -> minimal-pad fallback path.
    xo = jax.random.normal(k2, (3, 5, 7, 11), dtype=jnp.float32) * 2.0
    yo = jax.block_until_ready(mish(xo))
    assert yo.shape == xo.shape
    assert jnp.allclose(yo, _mish_ref(xo), atol=1e-5, rtol=1e-5)

    print("KERNEL_OK")
</pallas_src>

<mosaic_0001>
module attributes {stable_mosaic.version = 11 : i64} {
  func.func @_mish_kernel(%arg0: i32, %arg1: memref<2x1024xf32, #tpu.memory_space<vmem>>, %arg2: memref<2x1024xf32, #tpu.memory_space<vmem>>) attributes {dimension_semantics = [#tpu.dimension_semantics<parallel>], iteration_bounds = array<i64: 1>, scalar_prefetch = 0 : i64, scratch_operands = 0 : i64, tpu.core_type = #tpu.core_type<tc>, window_params = [{transform_indices = @transform_0, window_bounds = array<i64: 2, 1024>}, {transform_indices = @transform_1, window_bounds = array<i64: 2, 1024>}]} {
    %c0 = arith.constant 0 : index
    %c0_0 = arith.constant 0 : index
    %0 = vector.load %arg1[%c0, %c0_0] : memref<2x1024xf32, #tpu.memory_space<vmem>>, vector<2x1024xf32>
    %cst = arith.constant 2.000000e+01 : f32
    %1 = vector.broadcast %cst : f32 to vector<2x1024xf32>
    %2 = arith.minimumf %0, %1 : vector<2x1024xf32>
    %3 = math.exp %2 : vector<2x1024xf32>
    %4 = arith.mulf %3, %3 : vector<2x1024xf32>
    %cst_1 = arith.constant 2.000000e+00 : f32
    %5 = vector.broadcast %cst_1 : f32 to vector<2x1024xf32>
    %6 = arith.mulf %5, %3 : vector<2x1024xf32>
    %7 = arith.addf %4, %6 : vector<2x1024xf32>
    %cst_2 = arith.constant 2.000000e+01 : f32
    %8 = vector.broadcast %cst_2 : f32 to vector<2x1024xf32>
    %9 = arith.cmpf ogt, %0, %8 : vector<2x1024xf32>
    %cst_3 = arith.constant 2.000000e+00 : f32
    %10 = vector.broadcast %cst_3 : f32 to vector<2x1024xf32>
    %11 = arith.addf %7, %10 : vector<2x1024xf32>
    %12 = arith.divf %7, %11 : vector<2x1024xf32>
    %13 = arith.mulf %0, %12 : vector<2x1024xf32>
    %14 = arith.select %9, %0, %13 : vector<2x1024xi1>, vector<2x1024xf32>
    %c0_4 = arith.constant 0 : index
    %c0_5 = arith.constant 0 : index
    %15 = vector.load %arg2[%c0_4, %c0_5] : memref<2x1024xf32, #tpu.memory_space<vmem>>, vector<2x1024xf32>
    tpu.vector_store %arg2[%c0_4, %c0_5], %14 {strides = array<i32>} : memref<2x1024xf32, #tpu.memory_space<vmem>>, vector<2x1024xf32>,
    return
  }
  func.func @transform_0(%arg0: i32) -> (i32, i32) {
    %c0_i32 = arith.constant 0 : i32
    %c0_i32_0 = arith.constant 0 : i32
    return %arg0, %c0_i32 : i32, i32
  }
  func.func @transform_1(%arg0: i32) -> (i32, i32) {
    %c0_i32 = arith.constant 0 : i32
    %c0_i32_0 = arith.constant 0 : i32
    return %arg0, %c0_i32 : i32, i32
  }
}

</mosaic_0001>

<bundles_post_ra>
// kernel: tpu_custom_call.1
= control target key start
LH: loop header
LB: loop body
LE: loop exit
PB: predicated region body
PF: predicated region fallthrough
CT: control target
= control target key end

     0   :  { %6 = vsyncpa [#allocation3], 0  ;;  %s158_s0 = inlined_call_operand.hbm [shape: f32[2,1024], index: 0, kind: input, shape index: {}]   ;;  %s159_s1 = inlined_call_operand.hbm [shape: f32[2,1024], index: 1, kind: output, shape index: {}]  }
   0x1   :  { %7 = vsyncpa [#allocation4], 0  ;;  %s122_s6 = smov [#allocation2]   ;;  %s74_s10 = scalar_lea.hbm %s158_s0, 256 }
   0x2   :  { %s14_s7 = sshll.u32 %s122_s6, 4  ;;  %p75_p0 = scmp.ne.s32.totalorder %s158_s0, %s74_s10  ;;  %s15_s7 = int_to_ptr.vmem [resolvable:$true] %s14_s7 }
   0x3   :  { %p78_p1 = scmp.lt.u32.totalorder %s74_s10, %s158_s0 }
   0x5   :  { %p80_p2 = pnand %p78_p1, %p75_p0 }
   0x7   :  { %83 = shalt.err (!%p80_p2)
}
   0x8   :  { %s84_s15 = scalar_lea.vmem %s15_s7, 256  ;;  %p89_p4 = scmp.lt.s32.totalorder %s15_s7, %s15_s7 }
   0x9   :  { %p85_p3 = scmp.ne.s32.totalorder %s15_s7, %s84_s15  ;;  %p90_p5 = scmp.lt.s32.totalorder %s84_s15, %s84_s15 }
   0xb   :  { %p91_p6 = por %p90_p5, %p89_p4 }
   0xd   :  { %p92_p7 = pnand %p91_p6, %p85_p3 }
   0xf   :  { %95 = shalt.err (!%p92_p7)
}
  0x10   :  { %17 = dma.hbm_to_vmem [thread:$0]  %s158_s0, 256, %s15_s7, [#allocation3]  }
  0x11   :  { %118 = dma.done.wait [#allocation3], 256  }
  0x12   :  { %119 = vsyncadd [#allocation3], 4294967040  ;;  %v21_v0 = vld [vmem:[#allocation2] sm:$0xff]  ;;  %v22_v1 = vld [vmem:[#allocation2 + $0x8] sm:$0xff]  ;;  %s123_s0 = smov [#allocation5]  }
  0x13   :  { %v23_v2 = vmin.f32 %v21_v0, 20.0  ;;  %v24_v3 = vmin.f32 %v22_v1, 20.0  ;;  %vm35_vm0 = vcmp.gt.f32.partialorder %v21_v0, 20.0  ;;  %s55_s18 = sshll.u32 %s123_s0, 4  ;;  %vm36_vm1 = vcmp.gt.f32.partialorder %v22_v1, 20.0  ;;  %s56_s18 = int_to_ptr.vmem [resolvable:$true] %s55_s18 }
  0x14   :  { %s96_s19 = scalar_lea.vmem %s56_s18, 256  ;;  %p101_p9 = scmp.lt.s32.totalorder %s56_s18, %s56_s18 }
  0x15   :  { %v25_v4 = vmul.f32 1.442695, %v23_v2  ;;  %v27_v5 = vmul.f32 1.442695, %v24_v3  ;;  %p97_p8 = scmp.ne.s32.totalorder %s56_s18, %s96_s19  ;;  %p102_p10 = scmp.lt.s32.totalorder %s96_s19, %s96_s19 }
  0x17   :  { %66 = vpow2.f32 %v25_v4  ;;  %p103_p11 = por %p102_p10, %p101_p9 }
  0x18   :  { %68 = vpow2.f32 %v27_v5 }
  0x19   :  { %p104_p12 = pnand %p103_p11, %p97_p8 }
  0x21   :  { %v67_v6 = vpop.eup %66 }
  0x22   :  { %v69_v7 = vpop.eup %68  ;;  %v29_v8 = vmul.f32 %v67_v6, %v67_v6  ;;  %v31_v9 = vmul.f32 2.0, %v67_v6 }
  0x23   :  { %v30_v10 = vmul.f32 %v69_v7, %v69_v7  ;;  %v32_v11 = vmul.f32 2.0, %v69_v7 }
  0x24   :  { %v33_v12 = vadd.f32 %v31_v9, %v29_v8 }
  0x25   :  { %v34_v13 = vadd.f32 %v32_v11, %v30_v10 }
  0x26   :  { %v37_v14 = vadd.f32 2.0, %v33_v12 }
  0x27   :  { %v38_v15 = vadd.f32 2.0, %v34_v13 }
  0x28   :  { %70 = vrcp.f32 %v37_v14 }
  0x29   :  { %72 = vrcp.f32 %v38_v15 }
  0x32   :  { %v71_v16 = vpop.eup %70 }
  0x33   :  { %v73_v17 = vpop.eup %72  ;;  %v40_v18 = vmul.f32 %v71_v16, %v33_v12 }
  0x34   :  { %v42_v19 = vmul.f32 %v73_v17, %v34_v13 }
  0x35   :  { %v43_v20 = vmul.f32 %v40_v18, %v21_v0 }
  0x36   :  { %v44_v21 = vmul.f32 %v42_v19, %v22_v1 }
  0x37   :  { %v45_v22 = vsel %vm35_vm0, %v21_v0, %v43_v20 }
  0x38   :  { %47 = vst [vmem:[#allocation5] sm:$0xff] %v45_v22  ;;  %v46_v23 = vsel %vm36_vm1, %v22_v1, %v44_v21 }
  0x39   :  { %48 = vst [vmem:[#allocation5 + $0x8] sm:$0xff] %v46_v23 }
  0x3a   :  { %107 = shalt.err (!%p104_p12)
}
  0x3b   :  { %s108_s22 = scalar_lea.hbm %s159_s1, 256 }
  0x3c   :  { %p109_p13 = scmp.ne.s32.totalorder %s159_s1, %s108_s22  ;;  %p112_p0 = scmp.lt.u32.totalorder %s108_s22, %s159_s1 }
  0x3e   :  { %p114_p1 = pnand %p112_p0, %p109_p13 }
  0x40   :  { %117 = shalt.err (!%p114_p1)
}
  0x41   :  { %58 = dma.vmem_to_hbm [thread:$0]  %s56_s18, 256, %s159_s1, [#allocation4]  }
  0x42   :  { %120 = dma.done.wait [#allocation4], 256  }
  0x43   :  { %121 = vsyncadd [#allocation4], 4294967040 }
  0x44   :  { %62 = vsyncpa [#allocation3], 1 }
  0x45   :  { %63 = vsyncpa [#allocation4], 1 }

</bundles_post_ra>
